<compile_context>
chip_gen: v7x
topology: tpu7x:2x2x1
jax: 0.10.0
libtpu: 0.0.40
codegen_flags: <defaults>
</compile_context>

<pallas_src>
import functools

import jax
import jax.numpy as jnp
from jax.experimental import pallas as pl
from jax.experimental.pallas import tpu as pltpu


def _round_up(x: int, m: int) -> int:
    return (x + m - 1) // m * m


def _tile_and_pad(dim: int, unit: int, max_tile: int, pref_unit: int | None = None):
    """Pick (tile, padded_dim): tile is a multiple of `unit`, padded_dim of tile.

    If the (minimally padded) dim fits in one block, the whole dim is a single
    resident block.  Otherwise the dim is split into ceil(dim/max_tile) tiles
    and padded up to the tile -- never degenerating to unit-sized tiles.
    """
    minimal = _round_up(dim, unit)
    if minimal <= max_tile:
        return minimal, minimal
    num = -(-minimal // max_tile)                       # ceil
    tile = _round_up(-(-dim // num), unit)
    if pref_unit and tile % pref_unit:
        t2 = _round_up(tile, pref_unit)                 # prefer 256-mult tiles (v6e/v7x MXU)
        if t2 <= max_tile and t2 * num <= minimal * 9 // 8:
            tile = t2
    return tile, tile * num


def _pad_to(a, target_shape):
    pads = [(0, t - s) for s, t in zip(a.shape, target_shape)]
    if all(p == (0, 0) for p in pads):
        return a
    return jnp.pad(a, pads)


# ---------------------------------------------------------------------------
# Kernels
# ---------------------------------------------------------------------------

def _matmul_bias_kernel(x_ref, w_ref, b_ref, o_ref):
    """Single-K-block path: o = x @ W.T + b (no scratch, no control flow)."""
    # x_ref: (ts, tk)  w_ref: (tn, tk)  b_ref: (1, tn)  o_ref: (ts, tn)
    acc = jax.lax.dot_general(
        x_ref[...], w_ref[...],
        dimension_numbers=(((1,), (1,)), ((), ())),      # contract x's K with W's dim 1
        preferred_element_type=jnp.float32,
    )
    o_ref[...] = (acc + b_ref[...]).astype(o_ref.dtype)


def _matmul_bias_acc_kernel(x_ref, w_ref, b_ref, o_ref, acc_ref, *, k_last: int):
    """K-tiled path: f32 accumulator, bias folded into the k==0 init."""
    k = pl.program_id(2)          # read grid indices ONLY at top level (never inside pl.when)

    @pl.when(k == 0)
    def _init():
        acc_ref[...] = jnp.broadcast_to(b_ref[...], acc_ref.shape)

    acc_ref[...] += jax.lax.dot_general(
        x_ref[...], w_ref[...],
        dimension_numbers=(((1,), (1,)), ((), ())),
        preferred_element_type=jnp.float32,
    )

    @pl.when(k == k_last)
    def _finalize():
        o_ref[...] = acc_ref[...].astype(o_ref.dtype)


# ---------------------------------------------------------------------------
# Wrapper
# ---------------------------------------------------------------------------

def retrieval_linear(x, neighbors, weight, bias, mask_param, *,
                     cls_pos: int = 0,
                     compute_dtype=jnp.bfloat16,
                     max_ts: int = 512, max_tn: int = 512, max_tk: int = 2048):
    """Pallas forward of RetrievalLinear with fusion_strategy='mask_add_cls'.

    x: (B, S, Din); neighbors: (B, topk, Dout); weight: (Dout, Din) [PyTorch layout];
    bias: (Dout,); mask_param: (topk, 1).
    """
    B, S, Din = x.shape
    Dout, Din_w = weight.shape
    assert Din_w == Din and neighbors.shape[0] == B and neighbors.shape[2] == Dout
    assert 0 <= cls_pos < S
    out_dtype = x.dtype

    # ---- hoisted retrieval-fusion prologue (tiny, grid-invariant) ------------
    msm = jax.nn.softmax(mask_param.astype(jnp.float32), axis=0)                 # (topk, 1)
    nb_mean = jnp.mean(msm[None, :, :] * neighbors.astype(jnp.float32), axis=1)  # (B, Dout)

    # ---- flatten (B, S) -> M and pick MXU-shaped tiles ------------------------
    M = B * S
    sub_unit = 8 if jnp.dtype(compute_dtype).itemsize >= 4 else 16   # bf16 needs >=16 sublanes
    ts, m_pad = _tile_and_pad(M, sub_unit, max_ts)
    tn, n_pad = _tile_and_pad(Dout, 128, max_tn, pref_unit=256)
    tk, k_pad = _tile_and_pad(Din, 128, max_tk, pref_unit=256)
    n_tiles, m_tiles, k_tiles = n_pad // tn, m_pad // ts, k_pad // tk

    # NOTE: for a real model, cache wp/bp across calls (pad + cast once, not per forward).
    xp = _pad_to(x.reshape(M, Din), (m_pad, k_pad)).astype(compute_dtype)
    wp = _pad_to(weight, (n_pad, k_pad)).astype(compute_dtype)         # keep (out, in) layout
    bp = _pad_to(bias.reshape(1, Dout).astype(jnp.float32), (1, n_pad))

    # ---- VMEM budget (double-buffered in/out + acc), v7x(64 MiB/TC)-safe ------
    cbytes = jnp.dtype(compute_dtype).itemsize
    obytes = jnp.dtype(out_dtype).itemsize
    est = (2 * (ts * tk + tn * tk) * cbytes      # x / W double-buffered
           + 2 * ts * tn * obytes                # out double-buffered
           + 2 * tn * 4                          # bias
           + ts * tn * 4)                        # f32 accumulator (K path)
    vmem_limit = int(min(max(2 * est, 16 * 1024 * 1024), 48 * 1024 * 1024))

    if k_tiles == 1:
        # Whole K resident.  n OUTERMOST so the weight block index (n, 0) is
        # constant over the inner m sweep -> W is DMA'd once per n-tile.
        grid = (n_tiles, m_tiles)
        kernel = _matmul_bias_kernel
        in_specs = [
            pl.BlockSpec((ts, tk), lambda n, m: (m, 0)),       # x
            pl.BlockSpec((tn, tk), lambda n, m: (n, 0)),       # W (resident across m)
            pl.BlockSpec((1, tn),  lambda n, m: (0, n)),       # bias
        ]
        out_specs = pl.BlockSpec((ts, tn), lambda n, m: (m, n))
        scratch_shapes = []
        dims = ("parallel", "parallel")
    else:
        # Large Din: keep an innermost "arbitrary" K reduction with f32 scratch.
        grid = (n_tiles, m_tiles, k_tiles)
        kernel = functools.partial(_matmul_bias_acc_kernel, k_last=k_tiles - 1)
        in_specs = [
            pl.BlockSpec((ts, tk), lambda n, m, k: (m, k)),    # x
            pl.BlockSpec((tn, tk), lambda n, m, k: (n, k)),    # W
            pl.BlockSpec((1, tn),  lambda n, m, k: (0, n)),    # bias
        ]
        out_specs = pl.BlockSpec((ts, tn), lambda n, m, k: (m, n))
        scratch_shapes = [pltpu.VMEM((ts, tn), jnp.float32)]
        dims = ("parallel", "parallel", "arbitrary")

    out2d = pl.pallas_call(
        kernel,
        out_shape=jax.ShapeDtypeStruct((m_pad, n_pad), out_dtype),
        grid_spec=pltpu.PrefetchScalarGridSpec(
            num_scalar_prefetch=0,
            grid=grid,
            in_specs=in_specs,
            out_specs=out_specs,
            scratch_shapes=scratch_shapes,
        ),
        compiler_params=pltpu.CompilerParams(
            dimension_semantics=dims,          # outer axes parallel -> megacore-shardable
            vmem_limit_bytes=vmem_limit,
        ),
    )(xp, wp, bp)

    y = out2d[:M, :Dout].reshape(B, S, Dout)

    # CLS-row retrieval fusion: touches only B x Dout elements -> tiny XLA op
    # (done in f32, then cast, matching `result.to(previous_dtype)`).
    cls_row = (y[:, cls_pos, :].astype(jnp.float32) + nb_mean).astype(out_dtype)
    return y.at[:, cls_pos, :].set(cls_row)


def retrieval_linear_ref(x, neighbors, weight, bias, mask_param, cls_pos=0):
    """Pure-JAX reference mirroring RetrievalLinear.forward ('mask_add_cls')."""
    y = jnp.einsum("bsi,oi->bso", x.astype(jnp.float32),
                   weight.astype(jnp.float32)) + bias.astype(jnp.float32)
    msm = jax.nn.softmax(mask_param.astype(jnp.float32), axis=0)                 # (topk, 1)
    nb = jnp.mean(msm[None, :, :] * neighbors.astype(jnp.float32), axis=1)       # (B, Dout)
    return y.at[:, cls_pos, :].add(nb).astype(x.dtype)


if __name__ == "__main__":
    def _run_case(B, S, Din, Dout, topk, seed, **kernel_kwargs):
        key = jax.random.PRNGKey(seed)
        k_x, k_nb, k_w, k_b, k_m = jax.random.split(key, 5)
        x = jax.random.normal(k_x, (B, S, Din), dtype=jnp.float32)
        # synthetic deterministic "retrieval" result: (B, topk, retrieval_dim=Dout)
        neighbors = jax.random.normal(k_nb, (B, topk, Dout), dtype=jnp.float32)
        # nn.Linear-style parameters
        weight = jax.random.normal(k_w, (Dout, Din), dtype=jnp.float32) * 0.05
        bias = jax.random.normal(k_b, (Dout,), dtype=jnp.float32) * 0.1
        # ReFusionLayer.mask: (topk, 1)
        mask_param = jax.random.normal(k_m, (topk, 1), dtype=jnp.float32)

        ref = retrieval_linear_ref(x, neighbors, weight, bias, mask_param)
        out = jax.block_until_ready(
            retrieval_linear(x, neighbors, weight, bias, mask_param, **kernel_kwargs))
        assert out.shape == (B, S, Dout) and out.dtype == x.dtype
        assert jnp.allclose(out, ref, atol=3e-2, rtol=3e-2), "kernel vs reference"

    # tiny, module-consistent shapes (whole W resident, grid (1, 1))
    _run_case(B=2, S=8, Din=32, Dout=32, topk=4, seed=0)
    # moderate shapes: whole bf16 weight resident, grid effectively 1-D over M tiles
    _run_case(B=2, S=320, Din=384, Dout=320, topk=8, seed=1)
    # forced N/K tiling: exercises the K-reduction accumulator path (grid (3, 2, 3))
    _run_case(B=2, S=320, Din=384, Dout=320, topk=8, seed=2, max_tn=128, max_tk=128)
    # f32 MXU-input path (tolerance kept loose for TPU f32-matmul pass behaviour)
    _run_case(B=2, S=8, Din=32, Dout=32, topk=4, seed=3, compute_dtype=jnp.float32)

    print("KERNEL_OK")
</pallas_src>

<mosaic_0001>
module attributes {stable_mosaic.version = 11 : i64} {
  func.func @_matmul_bias_kernel(%arg0: i32, %arg1: i32, %arg2: memref<16x128xbf16, #tpu.memory_space<vmem>>, %arg3: memref<128x128xbf16, #tpu.memory_space<vmem>>, %arg4: memref<1x128xf32, #tpu.memory_space<vmem>>, %arg5: memref<16x128xf32, #tpu.memory_space<vmem>>) attributes {dimension_semantics = [#tpu.dimension_semantics<parallel>, #tpu.dimension_semantics<parallel>], iteration_bounds = array<i64: 1, 1>, scalar_prefetch = 0 : i64, scratch_operands = 0 : i64, tpu.core_type = #tpu.core_type<tc>, window_params = [{transform_indices = @transform_0, window_bounds = array<i64: 16, 128>}, {transform_indices = @transform_1, window_bounds = array<i64: 128, 128>}, {transform_indices = @transform_2, window_bounds = array<i64: 1, 128>}, {transform_indices = @transform_3, window_bounds = array<i64: 16, 128>}]} {
    %c0 = arith.constant 0 : index
    %c0_0 = arith.constant 0 : index
    %0 = vector.load %arg2[%c0, %c0_0] : memref<16x128xbf16, #tpu.memory_space<vmem>>, vector<16x128xbf16>
    %c0_1 = arith.constant 0 : index
    %c0_2 = arith.constant 0 : index
    %1 = vector.load %arg3[%c0_1, %c0_2] : memref<128x128xbf16, #tpu.memory_space<vmem>>, vector<128x128xbf16>
    %cst = arith.constant dense<0.000000e+00> : vector<16x128xf32>
    %2 = tpu.matmul %0, %1, %cst {dimension_numbers = #tpu.dot_dimension_numbers<[1], [1], [0], [0], [0, 0, 1, 0], [], []>} : vector<16x128xbf16>, vector<128x128xbf16>, vector<16x128xf32> -> vector<16x128xf32>
    %c0_3 = arith.constant 0 : index
    %c0_4 = arith.constant 0 : index
    %3 = vector.load %arg4[%c0_3, %c0_4] : memref<1x128xf32, #tpu.memory_space<vmem>>, vector<1x128xf32>
    %4 = vector.broadcast %3 : vector<1x128xf32> to vector<16x128xf32>
    %5 = arith.addf %2, %4 : vector<16x128xf32>
    %c0_5 = arith.constant 0 : index
    %c0_6 = arith.constant 0 : index
    %6 = vector.load %arg5[%c0_5, %c0_6] : memref<16x128xf32, #tpu.memory_space<vmem>>, vector<16x128xf32>
    tpu.vector_store %arg5[%c0_5, %c0_6], %5 {strides = array<i32>} : memref<16x128xf32, #tpu.memory_space<vmem>>, vector<16x128xf32>,
    return
  }
  func.func @transform_0(%arg0: i32, %arg1: i32) -> (i32, i32) {
    %c0_i32 = arith.constant 0 : i32
    %c0_i32_0 = arith.constant 0 : i32
    return %arg1, %c0_i32 : i32, i32
  }
  func.func @transform_1(%arg0: i32, %arg1: i32) -> (i32, i32) {
    %c0_i32 = arith.constant 0 : i32
    %c0_i32_0 = arith.constant 0 : i32
    return %arg0, %c0_i32 : i32, i32
  }
  func.func @transform_2(%arg0: i32, %arg1: i32) -> (i32, i32) {
    %c0_i32 = arith.constant 0 : i32
    %c0_i32_0 = arith.constant 0 : i32
    return %c0_i32, %arg0 : i32, i32
  }
  func.func @transform_3(%arg0: i32, %arg1: i32) -> (i32, i32) {
    %c0_i32 = arith.constant 0 : i32
    return %arg1, %arg0 : i32, i32
  }
}

</mosaic_0001>

<bundles_post_ra>
// kernel: tpu_custom_call.1
= control target key start
LH: loop header
LB: loop body
LE: loop exit
PB: predicated region body
PF: predicated region fallthrough
CT: control target
= control target key end

     0   :  { %8 = vsyncpa [#allocation3], 0  ;;  %s381_s0 = inlined_call_operand.hbm [shape: bf16[16,128], index: 0, kind: input, shape index: {}]   ;;  %s382_s1 = inlined_call_operand.hbm [shape: bf16[128,128], index: 1, kind: input, shape index: {}]   ;;  %s383_s2 = inlined_call_operand.vmem [shape: f32[1,128], index: 2, kind: input, shape index: {}]   ;;  %s384_s3 = inlined_call_operand.hbm [shape: f32[16,128], index: 3, kind: output, shape index: {}]  }
   0x1   :  { %9 = vsyncpa [#allocation6], 0 }
   0x2   :  { %10 = vsyncpa [#allocation4], 0  ;;  %s313_s12 = smov [#allocation2]   ;;  %s241_s16 = scalar_lea.hbm %s381_s0, 128 }
   0x3   :  { %s16_s13 = sshll.u32 %s313_s12, 4  ;;  %p242_p0 = scmp.ne.s32.totalorder %s381_s0, %s241_s16  ;;  %s17_s13 = int_to_ptr.vmem [resolvable:$true] %s16_s13 }
   0x4   :  { %p245_p1 = scmp.lt.u32.totalorder %s241_s16, %s381_s0 }
   0x6   :  { %p247_p2 = pnand %p245_p1, %p242_p0 }
   0x8   :  { %250 = shalt.err (!%p247_p2)
}
   0x9   :  { %s251_s21 = scalar_lea.vmem %s17_s13, 128  ;;  %p256_p4 = scmp.lt.s32.totalorder %s17_s13, %s17_s13 }
   0xa   :  { %p252_p3 = scmp.ne.s32.totalorder %s17_s13, %s251_s21  ;;  %p257_p5 = scmp.lt.s32.totalorder %s251_s21, %s251_s21 }
   0xc   :  { %p258_p6 = por %p257_p5, %p256_p4 }
   0xe   :  { %p259_p7 = pnand %p258_p6, %p252_p3 }
  0x10   :  { %262 = shalt.err (!%p259_p7)
}
  0x11   :  { %s314_s22 = smov 64   ;;  %s315_s23 = smov 4  }
  0x12   :  { %22 = dma.hbm_to_vmem [thread:$0]  %s381_s0, 128, %s17_s13, [#allocation3], %s314_s22, %s314_s22, %s315_s23  }
  0x13   :  { %s316_s26 = smov [#allocation5]   ;;  %s263_s30 = scalar_lea.hbm %s382_s1, 1024 }
  0x14   :  { %s28_s27 = sshll.u32 %s316_s26, 4  ;;  %p264_p8 = scmp.ne.s32.totalorder %s382_s1, %s263_s30  ;;  %s29_s27 = int_to_ptr.vmem [resolvable:$true] %s28_s27 }
  0x15   :  { %p267_p9 = scmp.lt.u32.totalorder %s263_s30, %s382_s1 }
  0x17   :  { %p269_p10 = pnand %p267_p9, %p264_p8 }
  0x19   :  { %272 = shalt.err (!%p269_p10)
}
  0x1a   :  { %s273_s8 = scalar_lea.vmem %s29_s27, 1024  ;;  %p278_p12 = scmp.lt.s32.totalorder %s29_s27, %s29_s27 }
  0x1b   :  { %p274_p11 = scmp.ne.s32.totalorder %s29_s27, %s273_s8  ;;  %p279_p13 = scmp.lt.s32.totalorder %s273_s8, %s273_s8 }
  0x1d   :  { %p280_p0 = por %p279_p13, %p278_p12 }
  0x1f   :  { %p281_p1 = pnand %p280_p0, %p274_p11 }
  0x21   :  { %284 = shalt.err (!%p281_p1)
}
  0x22   :  { %34 = dma.hbm_to_vmem [thread:$0]  %s382_s1, 1024, %s29_s27, [#allocation6], %s314_s22, %s314_s22, %s315_s23  }
  0x23   :  { %307 = dma.done.wait [#allocation3], 128  }
  0x24   :  { %308 = vsyncadd [#allocation3], 4294967168 }
  0x25   :  { %309 = dma.done.wait [#allocation6], 1024  }
  0x26   :  { %310 = vsyncadd [#allocation6], 4294966272  ;;  %v317_v0 = vmov 0.0   ;;  %vm318_vm0 = vmmov 0   ;;  %v232_v1 = vld [vmem:[#allocation5] sm:$0xff]   ;;  %v233_v2 = vld [vmem:[#allocation5 + $0x8] sm:$0xff]  }
  0x27   :  { %203 = vmatprep.subr.bf16.mxu0 %v317_v0  ;;  %219 = vmatprep.mubr.msk.bf16.mxu0 %vm318_vm0, %v317_v0  ;;  %v234_v3 = vld [vmem:[#allocation5 + $0x10] sm:$0xff]   ;;  %v235_v4 = vld [vmem:[#allocation5 + $0x18] sm:$0xff]   ;;  %v236_v5 = vld [vmem:[#allocation5 + $0x20] sm:$0xff]   ;;  %s319_s11 = smov [#allocation7]  }
  0x28   :  { %204 = vmatpush3.bf16.xpose.msra.mxu0 %v232_v1  ;;  %v237_v6 = vld [vmem:[#allocation5 + $0x28] sm:$0xff]   ;;  %v238_v7 = vld [vmem:[#allocation5 + $0x30] sm:$0xff]   ;;  %v239_v8 = vld [vmem:[#allocation5 + $0x38] sm:$0xff]   ;;  %s171_s12 = sshll.u32 %s319_s11, 4  ;;  %s172_s12 = int_to_ptr.vmem [resolvable:$true] %s171_s12 }
  0x29   :  { %205 = vmatprep.subr.bf16.mxu0 %v317_v0  ;;  %v240_v9 = vld [vmem:[#allocation2] sm:$0xff]   ;;  %s285_s13 = scalar_lea.vmem %s172_s12, 256  ;;  %p290_p3 = scmp.lt.s32.totalorder %s172_s12, %s172_s12 }
  0x2a   :  { %v184_v10 = vld [vmem:[%s383_s2] ss:$0 sm:$0xff]  ;;  %p286_p2 = scmp.ne.s32.totalorder %s172_s12, %s285_s13  ;;  %p291_p4 = scmp.lt.s32.totalorder %s285_s13, %s285_s13 }
  0x2c   :  { %p292_p5 = por %p291_p4, %p290_p3 }
  0x2e   :  { %p293_p6 = pnand %p292_p5, %p286_p2 }
  0x30   :  { %206 = vmatpush3.bf16.xpose.msra.mxu0 %v233_v2 }
  0x31   :  { %207 = vmatprep.subr.bf16.mxu0 %v317_v0 }
  0x38   :  { %208 = vmatpush3.bf16.xpose.msra.mxu0 %v234_v3 }
  0x39   :  { %209 = vmatprep.subr.bf16.mxu0 %v317_v0 }
  0x40   :  { %210 = vmatpush3.bf16.xpose.msra.mxu0 %v235_v4 }
  0x41   :  { %211 = vmatprep.subr.bf16.mxu0 %v317_v0 }
  0x48   :  { %212 = vmatpush3.bf16.xpose.msra.mxu0 %v236_v5 }
  0x49   :  { %213 = vmatprep.subr.bf16.mxu0 %v317_v0 }
  0x50   :  { %214 = vmatpush3.bf16.xpose.msra.mxu0 %v237_v6 }
  0x51   :  { %215 = vmatprep.subr.bf16.mxu0 %v317_v0 }
  0x58   :  { %216 = vmatpush3.bf16.xpose.msra.mxu0 %v238_v7 }
  0x59   :  { %217 = vmatprep.subr.bf16.mxu0 %v317_v0 }
  0x60   :  { %218 = vmatpush3.bf16.xpose.msra.mxu0 %v239_v8 }
  0x67   :  { %220 = vmatmul.mubr.bf16.vlgmr.msra.gmra.mrb[0].mxu0 %v240_v9 }
 0x13a   :  { %v157_v11 = vpop.f32.mrb[0].mxu0 }
 0x13b   :  { %v158_v12 = vadd.f32 %v184_v10, %v157_v11  ;;  %v221_v13 = vpop.f32.mrb[1].mxu0 }
 0x13c   :  { %v160_v14 = vpop.f32.mrb[2].mxu0 }
 0x13d   :  { %164 = vst [vmem:[#allocation7] sm:$0xff] %v158_v12  ;;  %v161_v15 = vadd.f32 %v184_v10, %v160_v14  ;;  %v222_v16 = vpop.f32.mrb[3].mxu0 }
 0x13f   :  { %165 = vst [vmem:[#allocation7 + $0x8] sm:$0xff] %v161_v15 }
 0x140   :  { %296 = shalt.err (!%p293_p6)
}
 0x141   :  { %s297_s15 = scalar_lea.hbm %s384_s3, 256 }
 0x142   :  { %p298_p7 = scmp.ne.s32.totalorder %s384_s3, %s297_s15  ;;  %p301_p8 = scmp.lt.u32.totalorder %s297_s15, %s384_s3 }
 0x144   :  { %p303_p9 = pnand %p301_p8, %p298_p7 }
 0x146   :  { %306 = shalt.err (!%p303_p9)
}
 0x147   :  { %s320_s20 = smov 128   ;;  %s321_s21 = smov 8  }
 0x148   :  { %177 = dma.vmem_to_hbm [thread:$0]  %s172_s12, 256, %s384_s3, [#allocation4], %s320_s20, %s320_s20, %s321_s21  }
 0x149   :  { %311 = dma.done.wait [#allocation4], 256  }
 0x14a   :  { %312 = vsyncadd [#allocation4], 4294967040 }
 0x14b   :  { %181 = vsyncpa [#allocation3], 1 }
 0x14c   :  { %182 = vsyncpa [#allocation6], 1 }
 0x14d   :  { %183 = vsyncpa [#allocation4], 1 }

</bundles_post_ra>
